<compile_context>
chip_gen: v6e
topology: v6e:2x2x1
jax: 0.10.0
libtpu: 0.0.40
codegen_flags: <defaults>
</compile_context>

<pallas_src>
import math

import jax
import jax.numpy as jnp
from jax.experimental import pallas as pl
from jax.experimental.pallas import tpu as pltpu

_SQRT_2_OVER_PI = 0.7978845608028654


def _gelu(x):
    # TODO(synk): nn.GELU() default is the exact erf form; the tanh approximation is used
    # because lax.erf lowering is not guaranteed in Mosaic (tanh goes to the EUP slot).
    return 0.5 * x * (1.0 + jnp.tanh(_SQRT_2_OVER_PI * (x + 0.044715 * x * x * x)))


def s4_block_kernel(u_ref, gamma_ref, beta_ref, kt_ref, dskip_ref, w_ref, b_ref, out_ref):
    rows, _ = u_ref.shape
    L = kt_ref.shape[0]

    u = u_ref[...]                                            # (rows, H) fp32

    # ---- LayerNorm over H (torch defaults: eps=1e-5, biased variance) ----
    mu = jnp.mean(u, axis=-1, keepdims=True)
    xc = u - mu
    var = jnp.mean(xc * xc, axis=-1, keepdims=True)
    xn = xc * jax.lax.rsqrt(var + 1e-5) * gamma_ref[...] + beta_ref[...]

    # ---- S4 (linear) SSM: depthwise causal conv + D skip ----
    #   y[l, h] = D[h] * xn[l, h] + sum_{d=0..l} K[d, h] * xn[l-d, h]
    # xn is laid out as (Bt*L, H).  pltpu.roll shifts along the flattened row axis; the
    # in-sequence row index l_idx masks rows whose source would wrap around or leak across
    # a sequence boundary (both cases have l_idx < d), so causality per sequence holds.
    row = jax.lax.broadcasted_iota(jnp.int32, (rows, 1), 0)
    if rows == L:
        l_idx = row
    elif (L & (L - 1)) == 0:
        l_idx = jnp.bitwise_and(row, L - 1)
    else:
        l_idx = row % L

    if L <= 32:
        # Small lag count: static unroll keeps every roll shift a compile-time constant and
        # the independent rolls give the scheduler ILP across the XLU/VPU slots.
        kt = kt_ref[...]                                      # (L, H), tiny, load once
        y = xn * (dskip_ref[...] + kt[0:1, :])                # d = 0 term (no roll / mask)
        for d in range(1, L):
            shifted = pltpu.roll(xn, shift=d, axis=0)
            y = y + jnp.where(l_idx >= d, shifted, 0.0) * kt[d:d + 1, :]
    else:
        # Realistic l_max: bounded-unroll fori_loop caps compile time and vreg live ranges
        # (static Python loops do not bound live ranges).
        y = xn * (dskip_ref[...] + kt_ref[pl.ds(0, 1), :])

        def lag_body(d, acc):
            shifted = pltpu.roll(xn, shift=d, axis=0)
            return acc + jnp.where(l_idx >= d, shifted, 0.0) * kt_ref[pl.ds(d, 1), :]

        y = jax.lax.fori_loop(1, L, lag_body, y, unroll=8)

    # ---- afterblock: GELU -> Linear(H, H) -> GELU (MXU matmul in bf16, f32 accumulate) ----
    g = _gelu(y).astype(jnp.bfloat16)
    z = jnp.dot(g, w_ref[...], preferred_element_type=jnp.float32) + b_ref[...]
    z = _gelu(z)

    # ---- residual (config.s4_resnet) ----
    out_ref[...] = (z + u).astype(out_ref.dtype)


def _pick_batch_tile(B, L, H):
    """Batch elements per grid step.

    Targets a few hundred matmul rows per step (MXU-native M), keeps the fp32 activation
    tile <= ~4 MiB (double-buffered in/out tiles stay inside every generation's VMEM),
    keeps >= 2 grid steps when possible so the "parallel" batch axis can be sharded across
    v7x's two TensorCores, and keeps the sublane block dim a multiple of 8.
    """
    target_rows = 512
    max_rows = max(L, (4 << 20) // (4 * max(H, 1)))
    best, best_key = B, None
    for d in range(1, B + 1):
        if B % d:
            continue
        rows = d * L
        if not ((rows % 8 == 0) or d == B) or rows > max_rows:
            continue
        key = (B // d >= 2 or B == 1,   # prefer >= 2 grid steps (v7x megacore)
               rows <= target_rows,     # prefer not overshooting the target tile
               rows)                    # then as many rows per step as possible
        if best_key is None or key > best_key:
            best, best_key = d, key
    return best


def _build_specs(rows, L, H, single_buffer_invariants):
    def inv(shape):
        index_map = lambda *_: (0,) * len(shape)
        if single_buffer_invariants:
            # Grid-invariant operands: one VMEM copy, no pointless double-buffering.
            return pl.BlockSpec(shape, index_map, pipeline_mode=pl.Buffered(1))
        return pl.BlockSpec(shape, index_map)

    in_specs = [
        pl.BlockSpec((rows, H), lambda g: (g, 0)),   # u, flattened to (B*L, H)
        inv((1, H)),                                 # LayerNorm gamma
        inv((1, H)),                                 # LayerNorm beta
        inv((L, H)),                                 # SSM kernel K^T  (lag, H)
        inv((1, H)),                                 # S4 D skip
        inv((H, H)),                                 # Linear weight W^T (bf16)
        inv((1, H)),                                 # Linear bias
    ]
    out_specs = pl.BlockSpec((rows, H), lambda g: (g, 0))
    return in_specs, out_specs


def s4_block_forward(u, params, batch_tile=None):
    B, L, H = u.shape
    # TODO(synk): H < 128 leaves lanes idle (production H assumed >= 128); lane-packing
    # several sequences per vreg with a segmented LayerNorm reduction is not done here.
    bt = batch_tile if batch_tile is not None else _pick_batch_tile(B, L, H)
    assert B % bt == 0 and ((bt * L) % 8 == 0 or bt == B)
    rows = bt * L

    u2 = u.reshape(B * L, H)
    args = (u2, params["gamma"], params["beta"], params["kt"], params["dskip"],
            params["w_t"], params["bias"])

    # VMEM budget: double-buffered in/out activation tiles + single-buffered params,
    # with headroom; clamped to [32 MiB, 64 MiB] so it is valid on v5e/v6e/v7x alike.
    tile_bytes = rows * H * 4
    param_bytes = H * H * 2 + L * H * 4 + 4 * H * 4
    vmem_limit = int(min(64 << 20, max(32 << 20, 6 * tile_bytes + 2 * param_bytes)))

    def run(single_buffer_invariants):
        in_specs, out_specs = _build_specs(rows, L, H, single_buffer_invariants)
        return pl.pallas_call(
            s4_block_kernel,
            out_shape=jax.ShapeDtypeStruct((B * L, H), u.dtype),
            grid=(B // bt,),
            in_specs=in_specs,
            out_specs=out_specs,
            input_output_aliases={0: 0},   # residual output overwrites u's buffer in place
            compiler_params=pltpu.CompilerParams(
                dimension_semantics=("parallel",),
                vmem_limit_bytes=vmem_limit),
        )(*args)

    try:
        out = run(single_buffer_invariants=True)
    except Exception:
        # Fallback for environments where pipeline_mode=pl.Buffered(1) is unsupported;
        # semantics are identical, the invariants are just double-buffered.
        out = run(single_buffer_invariants=False)

    next_state = None  # conv-mode S4 forward with no input state returns None next_state
    return out.reshape(B, L, H), next_state


def s4_block_reference(u, params):
    """Pure-JAX reference of the same forward pass (used for the correctness check)."""
    _, L, _ = u.shape
    mu = jnp.mean(u, axis=-1, keepdims=True)
    xc = u - mu
    var = jnp.mean(xc * xc, axis=-1, keepdims=True)
    xn = xc * jax.lax.rsqrt(var + 1e-5) * params["gamma"][0] + params["beta"][0]
    y = xn * params["dskip"][0]
    kt = params["kt"]
    for d in range(L):
        shifted = jnp.pad(xn, ((0, 0), (d, 0), (0, 0)))[:, :L, :]
        y = y + shifted * kt[d]
    g = _gelu(y).astype(jnp.bfloat16)
    z = jnp.dot(g, params["w_t"], preferred_element_type=jnp.float32) + params["bias"][0]
    z = _gelu(z)
    return z + u


def init_params(key, H, L, N, dt_min=1e-3, dt_max=1e-1):
    """Deterministic synthetic parameters matching the module's shapes."""
    ks = jax.random.split(key, 6)
    gamma = jnp.ones((1, H), jnp.float32)
    beta = jnp.zeros((1, H), jnp.float32)

    # SSM convolution kernel K (H, L), stored transposed as kt (L, H).
    # TODO(synk): full NPLR ('legs' measure) kernel generation (Cauchy / Woodbury) has no
    # clean Pallas equivalent; a diagonal (S4D-Lin, ZOH) state-space kernel is built in JAX.
    half = N // 2
    log_dt = jax.random.uniform(ks[0], (H,), jnp.float32,
                                minval=math.log(dt_min), maxval=math.log(dt_max))
    dt = jnp.exp(log_dt)                                       # (H,)
    A = -0.5 + 1j * math.pi * jnp.arange(half)                 # (half,) complex64
    C = (jax.random.normal(ks[1], (H, half)) +
         1j * jax.random.normal(ks[2], (H, half))) * math.sqrt(0.5)
    dtA = dt[:, None] * A[None, :]                             # (H, half)
    dA = jnp.exp(dtA)
    dB = (dA - 1.0) / A[None, :]                               # ZOH with B = 1
    pows = jnp.exp(dtA[:, :, None] * jnp.arange(L)[None, None, :])   # (H, half, L)
    K = 2.0 * jnp.real(jnp.einsum('hn,hn,hnl->hl', C, dB, pows))     # (H, L)
    kt = jnp.asarray(K.T, jnp.float32)                         # (L, H): kt[d, h] = K[h, d]

    dskip = jax.random.normal(ks[3], (1, H), jnp.float32)      # S4 D parameter

    bound = 1.0 / math.sqrt(H)                                 # torch nn.Linear default init
    w = jax.random.uniform(ks[4], (H, H), jnp.float32, -bound, bound)   # (out, in)
    w_t = jnp.asarray(w.T, jnp.bfloat16)   # applied as x @ W^T; stored bf16 for the MXU
    bias = jax.random.uniform(ks[5], (1, H), jnp.float32, -bound, bound)

    return dict(gamma=gamma, beta=beta, kt=kt, dskip=dskip, w_t=w_t, bias=bias)


if __name__ == "__main__":
    B, L, H, N = 2, 8, 32, 16   # batch, seq (l_max), hidden (H), d_state
    key = jax.random.PRNGKey(0)
    k_u, k_p = jax.random.split(key)
    u = jax.random.normal(k_u, (B, L, H), jnp.float32)
    params = init_params(k_p, H, L, N)

    y_ref = jax.block_until_ready(s4_block_reference(u, params))

    y, next_state = s4_block_forward(u, params)
    y = jax.block_until_ready(y)
    assert y.shape == (B, L, H) and y.dtype == jnp.float32
    assert next_state is None
    assert jnp.allclose(y, y_ref, atol=1e-2, rtol=1e-2), float(jnp.max(jnp.abs(y - y_ref)))

    print("KERNEL_OK")
</pallas_src>

<mosaic_0001>
module attributes {stable_mosaic.version = 11 : i64} {
  func.func @s4_block_kernel(%arg0: i32, %arg1: memref<8x32xf32, #tpu.memory_space<vmem>>, %arg2: memref<1x32xf32, #tpu.memory_space<vmem>>, %arg3: memref<1x32xf32, #tpu.memory_space<vmem>>, %arg4: memref<8x32xf32, #tpu.memory_space<vmem>>, %arg5: memref<1x32xf32, #tpu.memory_space<vmem>>, %arg6: memref<32x32xbf16, #tpu.memory_space<vmem>>, %arg7: memref<1x32xf32, #tpu.memory_space<vmem>>, %arg8: memref<8x32xf32, #tpu.memory_space<vmem>>) attributes {dimension_semantics = [#tpu.dimension_semantics<parallel>], iteration_bounds = array<i64: 2>, scalar_prefetch = 0 : i64, scratch_operands = 0 : i64, tpu.core_type = #tpu.core_type<tc>, window_params = [{transform_indices = @transform_0, window_bounds = array<i64: 8, 32>}, {pipeline_mode = #tpu.pipeline_mode<synchronous>, transform_indices = @transform_1, window_bounds = array<i64: 1, 32>}, {pipeline_mode = #tpu.pipeline_mode<synchronous>, transform_indices = @transform_2, window_bounds = array<i64: 1, 32>}, {pipeline_mode = #tpu.pipeline_mode<synchronous>, transform_indices = @transform_3, window_bounds = array<i64: 8, 32>}, {pipeline_mode = #tpu.pipeline_mode<synchronous>, transform_indices = @transform_4, window_bounds = array<i64: 1, 32>}, {pipeline_mode = #tpu.pipeline_mode<synchronous>, transform_indices = @transform_5, window_bounds = array<i64: 32, 32>}, {pipeline_mode = #tpu.pipeline_mode<synchronous>, transform_indices = @transform_6, window_bounds = array<i64: 1, 32>}, {transform_indices = @transform_7, window_bounds = array<i64: 8, 32>}]} {
    %c0 = arith.constant 0 : index
    %c0_0 = arith.constant 0 : index
    %0 = vector.load %arg1[%c0, %c0_0] : memref<8x32xf32, #tpu.memory_space<vmem>>, vector<8x32xf32>
    %cst = arith.constant dense<0.000000e+00> : vector<8xf32>
    %1 = vector.multi_reduction <add>, %0, %cst [1] : vector<8x32xf32> to vector<8xf32>
    %2 = vector.shape_cast %1 : vector<8xf32> to vector<8x1xf32>
    %cst_1 = arith.constant 3.200000e+01 : f32
    %3 = vector.broadcast %cst_1 : f32 to vector<8x1xf32>
    %4 = arith.divf %2, %3 : vector<8x1xf32>
    %5 = vector.broadcast %4 : vector<8x1xf32> to vector<8x32xf32>
    %6 = arith.subf %0, %5 : vector<8x32xf32>
    %7 = arith.mulf %6, %6 : vector<8x32xf32>
    %cst_2 = arith.constant dense<0.000000e+00> : vector<8xf32>
    %8 = vector.multi_reduction <add>, %7, %cst_2 [1] : vector<8x32xf32> to vector<8xf32>
    %9 = vector.shape_cast %8 : vector<8xf32> to vector<8x1xf32>
    %cst_3 = arith.constant 3.200000e+01 : f32
    %10 = vector.broadcast %cst_3 : f32 to vector<8x1xf32>
    %11 = arith.divf %9, %10 : vector<8x1xf32>
    %cst_4 = arith.constant 9.99999974E-6 : f32
    %12 = vector.broadcast %cst_4 : f32 to vector<8x1xf32>
    %13 = arith.addf %11, %12 : vector<8x1xf32>
    %14 = math.rsqrt %13 : vector<8x1xf32>
    %15 = vector.broadcast %14 : vector<8x1xf32> to vector<8x32xf32>
    %16 = arith.mulf %6, %15 : vector<8x32xf32>
    %c0_5 = arith.constant 0 : index
    %c0_6 = arith.constant 0 : index
    %17 = vector.load %arg2[%c0_5, %c0_6] : memref<1x32xf32, #tpu.memory_space<vmem>>, vector<1x32xf32>
    %18 = vector.broadcast %17 : vector<1x32xf32> to vector<8x32xf32>
    %19 = arith.mulf %16, %18 : vector<8x32xf32>
    %c0_7 = arith.constant 0 : index
    %c0_8 = arith.constant 0 : index
    %20 = vector.load %arg3[%c0_7, %c0_8] : memref<1x32xf32, #tpu.memory_space<vmem>>, vector<1x32xf32>
    %21 = vector.broadcast %20 : vector<1x32xf32> to vector<8x32xf32>
    %22 = arith.addf %19, %21 : vector<8x32xf32>
    %23 = tpu.iota {dimensions = array<i32: 0>} : vector<8x1xi32>
    %c0_9 = arith.constant 0 : index
    %c0_10 = arith.constant 0 : index
    %24 = vector.load %arg4[%c0_9, %c0_10] : memref<8x32xf32, #tpu.memory_space<vmem>>, vector<8x32xf32>
    %c0_11 = arith.constant 0 : index
    %c0_12 = arith.constant 0 : index
    %25 = vector.load %arg5[%c0_11, %c0_12] : memref<1x32xf32, #tpu.memory_space<vmem>>, vector<1x32xf32>
    %26 = vector.extract_strided_slice %24 {offsets = [0, 0], sizes = [1, 32], strides = [1, 1]} : vector<8x32xf32> to vector<1x32xf32>
    %27 = arith.addf %25, %26 : vector<1x32xf32>
    %28 = vector.broadcast %27 : vector<1x32xf32> to vector<8x32xf32>
    %29 = arith.mulf %22, %28 : vector<8x32xf32>
    %c1_i32 = arith.constant 1 : i32
    %30 = tpu.dynamic_rotate %22 by %c1_i32 dim 0 : vector<8x32xf32>, i32 -> vector<8x32xf32>
    %c1_i32_13 = arith.constant 1 : i32
    %31 = vector.broadcast %c1_i32_13 : i32 to vector<8x1xi32>
    %32 = arith.cmpi sge, %23, %31 : vector<8x1xi32>
    %cst_14 = arith.constant 0.000000e+00 : f32
    %33 = vector.shape_cast %32 : vector<8x1xi1> to vector<8x1xi1>
    %34 = vector.broadcast %33 : vector<8x1xi1> to vector<8x32xi1>
    %35 = vector.broadcast %cst_14 : f32 to vector<8x32xf32>
    %36 = arith.select %34, %30, %35 : vector<8x32xi1>, vector<8x32xf32>
    %37 = vector.extract_strided_slice %24 {offsets = [1, 0], sizes = [1, 32], strides = [1, 1]} : vector<8x32xf32> to vector<1x32xf32>
    %38 = vector.broadcast %37 : vector<1x32xf32> to vector<8x32xf32>
    %39 = arith.mulf %36, %38 : vector<8x32xf32>
    %40 = arith.addf %29, %39 : vector<8x32xf32>
    %c2_i32 = arith.constant 2 : i32
    %41 = tpu.dynamic_rotate %22 by %c2_i32 dim 0 : vector<8x32xf32>, i32 -> vector<8x32xf32>
    %c2_i32_15 = arith.constant 2 : i32
    %42 = vector.broadcast %c2_i32_15 : i32 to vector<8x1xi32>
    %43 = arith.cmpi sge, %23, %42 : vector<8x1xi32>
    %cst_16 = arith.constant 0.000000e+00 : f32
    %44 = vector.shape_cast %43 : vector<8x1xi1> to vector<8x1xi1>
    %45 = vector.broadcast %44 : vector<8x1xi1> to vector<8x32xi1>
    %46 = vector.broadcast %cst_16 : f32 to vector<8x32xf32>
    %47 = arith.select %45, %41, %46 : vector<8x32xi1>, vector<8x32xf32>
    %48 = vector.extract_strided_slice %24 {offsets = [2, 0], sizes = [1, 32], strides = [1, 1]} : vector<8x32xf32> to vector<1x32xf32>
    %49 = vector.broadcast %48 : vector<1x32xf32> to vector<8x32xf32>
    %50 = arith.mulf %47, %49 : vector<8x32xf32>
    %51 = arith.addf %40, %50 : vector<8x32xf32>
    %c3_i32 = arith.constant 3 : i32
    %52 = tpu.dynamic_rotate %22 by %c3_i32 dim 0 : vector<8x32xf32>, i32 -> vector<8x32xf32>
    %c3_i32_17 = arith.constant 3 : i32
    %53 = vector.broadcast %c3_i32_17 : i32 to vector<8x1xi32>
    %54 = arith.cmpi sge, %23, %53 : vector<8x1xi32>
    %cst_18 = arith.constant 0.000000e+00 : f32
    %55 = vector.shape_cast %54 : vector<8x1xi1> to vector<8x1xi1>
    %56 = vector.broadcast %55 : vector<8x1xi1> to vector<8x32xi1>
    %57 = vector.broadcast %cst_18 : f32 to vector<8x32xf32>
    %58 = arith.select %56, %52, %57 : vector<8x32xi1>, vector<8x32xf32>
    %59 = vector.extract_strided_slice %24 {offsets = [3, 0], sizes = [1, 32], strides = [1, 1]} : vector<8x32xf32> to vector<1x32xf32>
    %60 = vector.broadcast %59 : vector<1x32xf32> to vector<8x32xf32>
    %61 = arith.mulf %58, %60 : vector<8x32xf32>
    %62 = arith.addf %51, %61 : vector<8x32xf32>
    %c4_i32 = arith.constant 4 : i32
    %63 = tpu.dynamic_rotate %22 by %c4_i32 dim 0 : vector<8x32xf32>, i32 -> vector<8x32xf32>
    %c4_i32_19 = arith.constant 4 : i32
    %64 = vector.broadcast %c4_i32_19 : i32 to vector<8x1xi32>
    %65 = arith.cmpi sge, %23, %64 : vector<8x1xi32>
    %cst_20 = arith.constant 0.000000e+00 : f32
    %66 = vector.shape_cast %65 : vector<8x1xi1> to vector<8x1xi1>
    %67 = vector.broadcast %66 : vector<8x1xi1> to vector<8x32xi1>
    %68 = vector.broadcast %cst_20 : f32 to vector<8x32xf32>
    %69 = arith.select %67, %63, %68 : vector<8x32xi1>, vector<8x32xf32>
    %70 = vector.extract_strided_slice %24 {offsets = [4, 0], sizes = [1, 32], strides = [1, 1]} : vector<8x32xf32> to vector<1x32xf32>
    %71 = vector.broadcast %70 : vector<1x32xf32> to vector<8x32xf32>
    %72 = arith.mulf %69, %71 : vector<8x32xf32>
    %73 = arith.addf %62, %72 : vector<8x32xf32>
    %c5_i32 = arith.constant 5 : i32
    %74 = tpu.dynamic_rotate %22 by %c5_i32 dim 0 : vector<8x32xf32>, i32 -> vector<8x32xf32>
    %c5_i32_21 = arith.constant 5 : i32
    %75 = vector.broadcast %c5_i32_21 : i32 to vector<8x1xi32>
    %76 = arith.cmpi sge, %23, %75 : vector<8x1xi32>
    %cst_22 = arith.constant 0.000000e+00 : f32
    %77 = vector.shape_cast %76 : vector<8x1xi1> to vector<8x1xi1>
    %78 = vector.broadcast %77 : vector<8x1xi1> to vector<8x32xi1>
    %79 = vector.broadcast %cst_22 : f32 to vector<8x32xf32>
    %80 = arith.select %78, %74, %79 : vector<8x32xi1>, vector<8x32xf32>
    %81 = vector.extract_strided_slice %24 {offsets = [5, 0], sizes = [1, 32], strides = [1, 1]} : vector<8x32xf32> to vector<1x32xf32>
    %82 = vector.broadcast %81 : vector<1x32xf32> to vector<8x32xf32>
    %83 = arith.mulf %80, %82 : vector<8x32xf32>
    %84 = arith.addf %73, %83 : vector<8x32xf32>
    %c6_i32 = arith.constant 6 : i32
    %85 = tpu.dynamic_rotate %22 by %c6_i32 dim 0 : vector<8x32xf32>, i32 -> vector<8x32xf32>
    %c6_i32_23 = arith.constant 6 : i32
    %86 = vector.broadcast %c6_i32_23 : i32 to vector<8x1xi32>
    %87 = arith.cmpi sge, %23, %86 : vector<8x1xi32>
    %cst_24 = arith.constant 0.000000e+00 : f32
    %88 = vector.shape_cast %87 : vector<8x1xi1> to vector<8x1xi1>
    %89 = vector.broadcast %88 : vector<8x1xi1> to vector<8x32xi1>
    %90 = vector.broadcast %cst_24 : f32 to vector<8x32xf32>
    %91 = arith.select %89, %85, %90 : vector<8x32xi1>, vector<8x32xf32>
    %92 = vector.extract_strided_slice %24 {offsets = [6, 0], sizes = [1, 32], strides = [1, 1]} : vector<8x32xf32> to vector<1x32xf32>
    %93 = vector.broadcast %92 : vector<1x32xf32> to vector<8x32xf32>
    %94 = arith.mulf %91, %93 : vector<8x32xf32>
    %95 = arith.addf %84, %94 : vector<8x32xf32>
    %c7_i32 = arith.constant 7 : i32
    %96 = tpu.dynamic_rotate %22 by %c7_i32 dim 0 : vector<8x32xf32>, i32 -> vector<8x32xf32>
    %c7_i32_25 = arith.constant 7 : i32
    %97 = vector.broadcast %c7_i32_25 : i32 to vector<8x1xi32>
    %98 = arith.cmpi sge, %23, %97 : vector<8x1xi32>
    %cst_26 = arith.constant 0.000000e+00 : f32
    %99 = vector.shape_cast %98 : vector<8x1xi1> to vector<8x1xi1>
    %100 = vector.broadcast %99 : vector<8x1xi1> to vector<8x32xi1>
    %101 = vector.broadcast %cst_26 : f32 to vector<8x32xf32>
    %102 = arith.select %100, %96, %101 : vector<8x32xi1>, vector<8x32xf32>
    %103 = vector.extract_strided_slice %24 {offsets = [7, 0], sizes = [1, 32], strides = [1, 1]} : vector<8x32xf32> to vector<1x32xf32>
    %104 = vector.broadcast %103 : vector<1x32xf32> to vector<8x32xf32>
    %105 = arith.mulf %102, %104 : vector<8x32xf32>
    %106 = arith.addf %95, %105 : vector<8x32xf32>
    %cst_27 = arith.constant 5.000000e-01 : f32
    %107 = vector.broadcast %cst_27 : f32 to vector<8x32xf32>
    %108 = arith.mulf %107, %106 : vector<8x32xf32>
    %cst_28 = arith.constant 4.471500e-02 : f32
    %109 = vector.broadcast %cst_28 : f32 to vector<8x32xf32>
    %110 = arith.mulf %109, %106 : vector<8x32xf32>
    %111 = arith.mulf %110, %106 : vector<8x32xf32>
    %112 = arith.mulf %111, %106 : vector<8x32xf32>
    %113 = arith.addf %106, %112 : vector<8x32xf32>
    %cst_29 = arith.constant 0.797884583 : f32
    %114 = vector.broadcast %cst_29 : f32 to vector<8x32xf32>
    %115 = arith.mulf %114, %113 : vector<8x32xf32>
    %116 = math.tanh %115 : vector<8x32xf32>
    %cst_30 = arith.constant 1.000000e+00 : f32
    %117 = vector.broadcast %cst_30 : f32 to vector<8x32xf32>
    %118 = arith.addf %117, %116 : vector<8x32xf32>
    %119 = arith.mulf %108, %118 : vector<8x32xf32>
    %120 = arith.truncf %119 : vector<8x32xf32> to vector<8x32xbf16>
    %c0_31 = arith.constant 0 : index
    %c0_32 = arith.constant 0 : index
    %121 = vector.load %arg6[%c0_31, %c0_32] : memref<32x32xbf16, #tpu.memory_space<vmem>>, vector<32x32xbf16>
    %cst_33 = arith.constant dense<0.000000e+00> : vector<8x32xf32>
    %122 = tpu.matmul %120, %121, %cst_33 {dimension_numbers = #tpu.dot_dimension_numbers<[1], [0], [0], [1], [0, 0, 1, 1], [], []>} : vector<8x32xbf16>, vector<32x32xbf16>, vector<8x32xf32> -> vector<8x32xf32>
    %c0_34 = arith.constant 0 : index
    %c0_35 = arith.constant 0 : index
    %123 = vector.load %arg7[%c0_34, %c0_35] : memref<1x32xf32, #tpu.memory_space<vmem>>, vector<1x32xf32>
    %124 = vector.broadcast %123 : vector<1x32xf32> to vector<8x32xf32>
    %125 = arith.addf %122, %124 : vector<8x32xf32>
    %cst_36 = arith.constant 5.000000e-01 : f32
    %126 = vector.broadcast %cst_36 : f32 to vector<8x32xf32>
    %127 = arith.mulf %126, %125 : vector<8x32xf32>
    %cst_37 = arith.constant 4.471500e-02 : f32
    %128 = vector.broadcast %cst_37 : f32 to vector<8x32xf32>
    %129 = arith.mulf %128, %125 : vector<8x32xf32>
    %130 = arith.mulf %129, %125 : vector<8x32xf32>
    %131 = arith.mulf %130, %125 : vector<8x32xf32>
    %132 = arith.addf %125, %131 : vector<8x32xf32>
    %cst_38 = arith.constant 0.797884583 : f32
    %133 = vector.broadcast %cst_38 : f32 to vector<8x32xf32>
    %134 = arith.mulf %133, %132 : vector<8x32xf32>
    %135 = math.tanh %134 : vector<8x32xf32>
    %cst_39 = arith.constant 1.000000e+00 : f32
    %136 = vector.broadcast %cst_39 : f32 to vector<8x32xf32>
    %137 = arith.addf %136, %135 : vector<8x32xf32>
    %138 = arith.mulf %127, %137 : vector<8x32xf32>
    %139 = arith.addf %138, %0 : vector<8x32xf32>
    %c0_40 = arith.constant 0 : index
    %c0_41 = arith.constant 0 : index
    %140 = vector.load %arg8[%c0_40, %c0_41] : memref<8x32xf32, #tpu.memory_space<vmem>>, vector<8x32xf32>
    tpu.vector_store %arg8[%c0_40, %c0_41], %139 {strides = array<i32>} : memref<8x32xf32, #tpu.memory_space<vmem>>, vector<8x32xf32>,
    return
  }
  func.func @transform_0(%arg0: i32) -> (i32, i32) {
    %c0_i32 = arith.constant 0 : i32
    %c0_i32_0 = arith.constant 0 : i32
    return %arg0, %c0_i32 : i32, i32
  }
  func.func @transform_1(%arg0: i32) -> (i32, i32) {
    %c0_i32 = arith.constant 0 : i32
    %c0_i32_0 = arith.constant 0 : i32
    %c0_i32_1 = arith.constant 0 : i32
    return %c0_i32, %c0_i32_0 : i32, i32
  }
  func.func @transform_2(%arg0: i32) -> (i32, i32) {
    %c0_i32 = arith.constant 0 : i32
    %c0_i32_0 = arith.constant 0 : i32
    %c0_i32_1 = arith.constant 0 : i32
    return %c0_i32, %c0_i32_0 : i32, i32
  }
  func.func @transform_3(%arg0: i32) -> (i32, i32) {
    %c0_i32 = arith.constant 0 : i32
    %c0_i32_0 = arith.constant 0 : i32
    %c0_i32_1 = arith.constant 0 : i32
    return %c0_i32, %c0_i32_0 : i32, i32
  }
  func.func @transform_4(%arg0: i32) -> (i32, i32) {
    %c0_i32 = arith.constant 0 : i32
    %c0_i32_0 = arith.constant 0 : i32
    %c0_i32_1 = arith.constant 0 : i32
    return %c0_i32, %c0_i32_0 : i32, i32
  }
  func.func @transform_5(%arg0: i32) -> (i32, i32) {
    %c0_i32 = arith.constant 0 : i32
    %c0_i32_0 = arith.constant 0 : i32
    %c0_i32_1 = arith.constant 0 : i32
    return %c0_i32, %c0_i32_0 : i32, i32
  }
  func.func @transform_6(%arg0: i32) -> (i32, i32) {
    %c0_i32 = arith.constant 0 : i32
    %c0_i32_0 = arith.constant 0 : i32
    %c0_i32_1 = arith.constant 0 : i32
    return %c0_i32, %c0_i32_0 : i32, i32
  }
  func.func @transform_7(%arg0: i32) -> (i32, i32) {
    %c0_i32 = arith.constant 0 : i32
    %c0_i32_0 = arith.constant 0 : i32
    return %arg0, %c0_i32 : i32, i32
  }
}

module attributes {stable_mosaic.version = 11 : i64} {
  func.func @s4_block_kernel(%arg0: i32, %arg1: memref<8x32xf32, #tpu.memory_space<vmem>>, %arg2: memref<1x32xf32, #tpu.memory_space<vmem>>, %arg3: memref<1x32xf32, #tpu.memory_space<vmem>>, %arg4: memref<8x32xf32, #tpu.memory_space<vmem>>, %arg5: memref<1x32xf32, #tpu.memory_space<vmem>>, %arg6: memref<32x32xbf16, #tpu.memory_space<vmem>>, %arg7: memref<1x32xf32, #tpu.memory_space<vmem>>, %arg8: memref<8x32xf32, #tpu.memory_space<vmem>>) attributes {dimension_semantics = [#tpu.dimension_semantics<parallel>], iteration_bounds = array<i64: 2>, scalar_prefetch = 0 : i64, scratch_operands = 0 : i64, tpu.core_type = #tpu.core_type<tc>, window_params = [{transform_indices = @transform_0, window_bounds = array<i64: 8, 32>}, {pipeline_mode = #tpu.pipeline_mode<synchronous>, transform_indices = @transform_1, window_bounds = array<i64: 1, 32>}, {pipeline_mode = #tpu.pipeline_mode<synchronous>, transform_indices = @transform_2, window_bounds = array<i64: 1, 32>}, {pipeline_mode = #tpu.pipeline_mode<synchronous>, transform_indices = @transform_3, window_bounds = array<i64: 8, 32>}, {pipeline_mode = #tpu.pipeline_mode<synchronous>, transform_indices = @transform_4, window_bounds = array<i64: 1, 32>}, {pipeline_mode = #tpu.pipeline_mode<synchronous>, transform_indices = @transform_5, window_bounds = array<i64: 32, 32>}, {pipeline_mode = #tpu.pipeline_mode<synchronous>, transform_indices = @transform_6, window_bounds = array<i64: 1, 32>}, {transform_indices = @transform_7, window_bounds = array<i64: 8, 32>}]} {
    %c0 = arith.constant 0 : index
    %c0_0 = arith.constant 0 : index
    %0 = vector.load %arg1[%c0, %c0_0] : memref<8x32xf32, #tpu.memory_space<vmem>>, vector<8x32xf32>
    %cst = arith.constant dense<0.000000e+00> : vector<8xf32>
    %1 = vector.multi_reduction <add>, %0, %cst [1] : vector<8x32xf32> to vector<8xf32>
    %2 = vector.shape_cast %1 : vector<8xf32> to vector<8x1xf32>
    %cst_1 = arith.constant 3.200000e+01 : f32
    %3 = vector.broadcast %cst_1 : f32 to vector<8x1xf32>
    %4 = arith.divf %2, %3 : vector<8x1xf32>
    %5 = vector.broadcast %4 : vector<8x1xf32> to vector<8x32xf32>
    %6 = arith.subf %0, %5 : vector<8x32xf32>
    %7 = arith.mulf %6, %6 : vector<8x32xf32>
    %cst_2 = arith.constant dense<0.000000e+00> : vector<8xf32>
    %8 = vector.multi_reduction <add>, %7, %cst_2 [1] : vector<8x32xf32> to vector<8xf32>
    %9 = vector.shape_cast %8 : vector<8xf32> to vector<8x1xf32>
    %cst_3 = arith.constant 3.200000e+01 : f32
    %10 = vector.broadcast %cst_3 : f32 to vector<8x1xf32>
    %11 = arith.divf %9, %10 : vector<8x1xf32>
    %cst_4 = arith.constant 9.99999974E-6 : f32
    %12 = vector.broadcast %cst_4 : f32 to vector<8x1xf32>
    %13 = arith.addf %11, %12 : vector<8x1xf32>
    %14 = math.rsqrt %13 : vector<8x1xf32>
    %15 = vector.broadcast %14 : vector<8x1xf32> to vector<8x32xf32>
    %16 = arith.mulf %6, %15 : vector<8x32xf32>
    %c0_5 = arith.constant 0 : index
    %c0_6 = arith.constant 0 : index
    %17 = vector.load %arg2[%c0_5, %c0_6] : memref<1x32xf32, #tpu.memory_space<vmem>>, vector<1x32xf32>
    %18 = vector.broadcast %17 : vector<1x32xf32> to vector<8x32xf32>
    %19 = arith.mulf %16, %18 : vector<8x32xf32>
    %c0_7 = arith.constant 0 : index
    %c0_8 = arith.constant 0 : index
    %20 = vector.load %arg3[%c0_7, %c0_8] : memref<1x32xf32, #tpu.memory_space<vmem>>, vector<1x32xf32>
    %21 = vector.broadcast %20 : vector<1x32xf32> to vector<8x32xf32>
    %22 = arith.addf %19, %21 : vector<8x32xf32>
    %23 = tpu.iota {dimensions = array<i32: 0>} : vector<8x1xi32>
    %c0_9 = arith.constant 0 : index
    %c0_10 = arith.constant 0 : index
    %24 = vector.load %arg4[%c0_9, %c0_10] : memref<8x32xf32, #tpu.memory_space<vmem>>, vector<8x32xf32>
    %c0_11 = arith.constant 0 : index
    %c0_12 = arith.constant 0 : index
    %25 = vector.load %arg5[%c0_11, %c0_12] : memref<1x32xf32, #tpu.memory_space<vmem>>, vector<1x32xf32>
    %26 = vector.extract_strided_slice %24 {offsets = [0, 0], sizes = [1, 32], strides = [1, 1]} : vector<8x32xf32> to vector<1x32xf32>
    %27 = arith.addf %25, %26 : vector<1x32xf32>
    %28 = vector.broadcast %27 : vector<1x32xf32> to vector<8x32xf32>
    %29 = arith.mulf %22, %28 : vector<8x32xf32>
    %c1_i32 = arith.constant 1 : i32
    %30 = tpu.dynamic_rotate %22 by %c1_i32 dim 0 : vector<8x32xf32>, i32 -> vector<8x32xf32>
    %c1_i32_13 = arith.constant 1 : i32
    %31 = vector.broadcast %c1_i32_13 : i32 to vector<8x1xi32>
    %32 = arith.cmpi sge, %23, %31 : vector<8x1xi32>
    %cst_14 = arith.constant 0.000000e+00 : f32
    %33 = vector.shape_cast %32 : vector<8x1xi1> to vector<8x1xi1>
    %34 = vector.broadcast %33 : vector<8x1xi1> to vector<8x32xi1>
    %35 = vector.broadcast %cst_14 : f32 to vector<8x32xf32>
    %36 = arith.select %34, %30, %35 : vector<8x32xi1>, vector<8x32xf32>
    %37 = vector.extract_strided_slice %24 {offsets = [1, 0], sizes = [1, 32], strides = [1, 1]} : vector<8x32xf32> to vector<1x32xf32>
    %38 = vector.broadcast %37 : vector<1x32xf32> to vector<8x32xf32>
    %39 = arith.mulf %36, %38 : vector<8x32xf32>
    %40 = arith.addf %29, %39 : vector<8x32xf32>
    %c2_i32 = arith.constant 2 : i32
    %41 = tpu.dynamic_rotate %22 by %c2_i32 dim 0 : vector<8x32xf32>, i32 -> vector<8x32xf32>
    %c2_i32_15 = arith.constant 2 : i32
    %42 = vector.broadcast %c2_i32_15 : i32 to vector<8x1xi32>
    %43 = arith.cmpi sge, %23, %42 : vector<8x1xi32>
    %cst_16 = arith.constant 0.000000e+00 : f32
    %44 = vector.shape_cast %43 : vector<8x1xi1> to vector<8x1xi1>
    %45 = vector.broadcast %44 : vector<8x1xi1> to vector<8x32xi1>
    %46 = vector.broadcast %cst_16 : f32 to vector<8x32xf32>
    %47 = arith.select %45, %41, %46 : vector<8x32xi1>, vector<8x32xf32>
    %48 = vector.extract_strided_slice %24 {offsets = [2, 0], sizes = [1, 32], strides = [1, 1]} : vector<8x32xf32> to vector<1x32xf32>
    %49 = vector.broadcast %48 : vector<1x32xf32> to vector<8x32xf32>
    %50 = arith.mulf %47, %49 : vector<8x32xf32>
    %51 = arith.addf %40, %50 : vector<8x32xf32>
    %c3_i32 = arith.constant 3 : i32
    %52 = tpu.dynamic_rotate %22 by %c3_i32 dim 0 : vector<8x32xf32>, i32 -> vector<8x32xf32>
    %c3_i32_17 = arith.constant 3 : i32
    %53 = vector.broadcast %c3_i32_17 : i32 to vector<8x1xi32>
    %54 = arith.cmpi sge, %23, %53 : vector<8x1xi32>
    %cst_18 = arith.constant 0.000000e+00 : f32
    %55 = vector.shape_cast %54 : vector<8x1xi1> to vector<8x1xi1>
    %56 = vector.broadcast %55 : vector<8x1xi1> to vector<8x32xi1>
    %57 = vector.broadcast %cst_18 : f32 to vector<8x32xf32>
    %58 = arith.select %56, %52, %57 : vector<8x32xi1>, vector<8x32xf32>
    %59 = vector.extract_strided_slice %24 {offsets = [3, 0], sizes = [1, 32], strides = [1, 1]} : vector<8x32xf32> to vector<1x32xf32>
    %60 = vector.broadcast %59 : vector<1x32xf32> to vector<8x32xf32>
    %61 = arith.mulf %58, %60 : vector<8x32xf32>
    %62 = arith.addf %51, %61 : vector<8x32xf32>
    %c4_i32 = arith.constant 4 : i32
    %63 = tpu.dynamic_rotate %22 by %c4_i32 dim 0 : vector<8x32xf32>, i32 -> vector<8x32xf32>
    %c4_i32_19 = arith.constant 4 : i32
    %64 = vector.broadcast %c4_i32_19 : i32 to vector<8x1xi32>
    %65 = arith.cmpi sge, %23, %64 : vector<8x1xi32>
    %cst_20 = arith.constant 0.000000e+00 : f32
    %66 = vector.shape_cast %65 : vector<8x1xi1> to vector<8x1xi1>
    %67 = vector.broadcast %66 : vector<8x1xi1> to vector<8x32xi1>
    %68 = vector.broadcast %cst_20 : f32 to vector<8x32xf32>
    %69 = arith.select %67, %63, %68 : vector<8x32xi1>, vector<8x32xf32>
    %70 = vector.extract_strided_slice %24 {offsets = [4, 0], sizes = [1, 32], strides = [1, 1]} : vector<8x32xf32> to vector<1x32xf32>
    %71 = vector.broadcast %70 : vector<1x32xf32> to vector<8x32xf32>
    %72 = arith.mulf %69, %71 : vector<8x32xf32>
    %73 = arith.addf %62, %72 : vector<8x32xf32>
    %c5_i32 = arith.constant 5 : i32
    %74 = tpu.dynamic_rotate %22 by %c5_i32 dim 0 : vector<8x32xf32>, i32 -> vector<8x32xf32>
    %c5_i32_21 = arith.constant 5 : i32
    %75 = vector.broadcast %c5_i32_21 : i32 to vector<8x1xi32>
    %76 = arith.cmpi sge, %23, %75 : vector<8x1xi32>
    %cst_22 = arith.constant 0.000000e+00 : f32
    %77 = vector.shape_cast %76 : vector<8x1xi1> to vector<8x1xi1>
    %78 = vector.broadcast %77 : vector<8x1xi1> to vector<8x32xi1>
    %79 = vector.broadcast %cst_22 : f32 to vector<8x32xf32>
    %80 = arith.select %78, %74, %79 : vector<8x32xi1>, vector<8x32xf32>
    %81 = vector.extract_strided_slice %24 {offsets = [5, 0], sizes = [1, 32], strides = [1, 1]} : vector<8x32xf32> to vector<1x32xf32>
    %82 = vector.broadcast %81 : vector<1x32xf32> to vector<8x32xf32>
    %83 = arith.mulf %80, %82 : vector<8x32xf32>
    %84 = arith.addf %73, %83 : vector<8x32xf32>
    %c6_i32 = arith.constant 6 : i32
    %85 = tpu.dynamic_rotate %22 by %c6_i32 dim 0 : vector<8x32xf32>, i32 -> vector<8x32xf32>
    %c6_i32_23 = arith.constant 6 : i32
    %86 = vector.broadcast %c6_i32_23 : i32 to vector<8x1xi32>
    %87 = arith.cmpi sge, %23, %86 : vector<8x1xi32>
    %cst_24 = arith.constant 0.000000e+00 : f32
    %88 = vector.shape_cast %87 : vector<8x1xi1> to vector<8x1xi1>
    %89 = vector.broadcast %88 : vector<8x1xi1> to vector<8x32xi1>
    %90 = vector.broadcast %cst_24 : f32 to vector<8x32xf32>
    %91 = arith.select %89, %85, %90 : vector<8x32xi1>, vector<8x32xf32>
    %92 = vector.extract_strided_slice %24 {offsets = [6, 0], sizes = [1, 32], strides = [1, 1]} : vector<8x32xf32> to vector<1x32xf32>
    %93 = vector.broadcast %92 : vector<1x32xf32> to vector<8x32xf32>
    %94 = arith.mulf %91, %93 : vector<8x32xf32>
    %95 = arith.addf %84, %94 : vector<8x32xf32>
    %c7_i32 = arith.constant 7 : i32
    %96 = tpu.dynamic_rotate %22 by %c7_i32 dim 0 : vector<8x32xf32>, i32 -> vector<8x32xf32>
    %c7_i32_25 = arith.constant 7 : i32
    %97 = vector.broadcast %c7_i32_25 : i32 to vector<8x1xi32>
    %98 = arith.cmpi sge, %23, %97 : vector<8x1xi32>
    %cst_26 = arith.constant 0.000000e+00 : f32
    %99 = vector.shape_cast %98 : vector<8x1xi1> to vector<8x1xi1>
    %100 = vector.broadcast %99 : vector<8x1xi1> to vector<8x32xi1>
    %101 = vector.broadcast %cst_26 : f32 to vector<8x32xf32>
    %102 = arith.select %100, %96, %101 : vector<8x32xi1>, vector<8x32xf32>
    %103 = vector.extract_strided_slice %24 {offsets = [7, 0], sizes = [1, 32], strides = [1, 1]} : vector<8x32xf32> to vector<1x32xf32>
    %104 = vector.broadcast %103 : vector<1x32xf32> to vector<8x32xf32>
    %105 = arith.mulf %102, %104 : vector<8x32xf32>
    %106 = arith.addf %95, %105 : vector<8x32xf32>
    %cst_27 = arith.constant 5.000000e-01 : f32
    %107 = vector.broadcast %cst_27 : f32 to vector<8x32xf32>
    %108 = arith.mulf %107, %106 : vector<8x32xf32>
    %cst_28 = arith.constant 4.471500e-02 : f32
    %109 = vector.broadcast %cst_28 : f32 to vector<8x32xf32>
    %110 = arith.mulf %109, %106 : vector<8x32xf32>
    %111 = arith.mulf %110, %106 : vector<8x32xf32>
    %112 = arith.mulf %111, %106 : vector<8x32xf32>
    %113 = arith.addf %106, %112 : vector<8x32xf32>
    %cst_29 = arith.constant 0.797884583 : f32
    %114 = vector.broadcast %cst_29 : f32 to vector<8x32xf32>
    %115 = arith.mulf %114, %113 : vector<8x32xf32>
    %116 = math.tanh %115 : vector<8x32xf32>
    %cst_30 = arith.constant 1.000000e+00 : f32
    %117 = vector.broadcast %cst_30 : f32 to vector<8x32xf32>
    %118 = arith.addf %117, %116 : vector<8x32xf32>
    %119 = arith.mulf %108, %118 : vector<8x32xf32>
    %120 = arith.truncf %119 : vector<8x32xf32> to vector<8x32xbf16>
    %c0_31 = arith.constant 0 : index
    %c0_32 = arith.constant 0 : index
    %121 = vector.load %arg6[%c0_31, %c0_32] : memref<32x32xbf16, #tpu.memory_space<vmem>>, vector<32x32xbf16>
    %cst_33 = arith.constant dense<0.000000e+00> : vector<8x32xf32>
    %122 = tpu.matmul %120, %121, %cst_33 {dimension_numbers = #tpu.dot_dimension_numbers<[1], [0], [0], [1], [0, 0, 1, 1], [], []>} : vector<8x32xbf16>, vector<32x32xbf16>, vector<8x32xf32> -> vector<8x32xf32>
    %c0_34 = arith.constant 0 : index
    %c0_35 = arith.constant 0 : index
    %123 = vector.load %arg7[%c0_34, %c0_35] : memref<1x32xf32, #tpu.memory_space<vmem>>, vector<1x32xf32>
    %124 = vector.broadcast %123 : vector<1x32xf32> to vector<8x32xf32>
    %125 = arith.addf %122, %124 : vector<8x32xf32>
    %cst_36 = arith.constant 5.000000e-01 : f32
    %126 = vector.broadcast %cst_36 : f32 to vector<8x32xf32>
    %127 = arith.mulf %126, %125 : vector<8x32xf32>
    %cst_37 = arith.constant 4.471500e-02 : f32
    %128 = vector.broadcast %cst_37 : f32 to vector<8x32xf32>
    %129 = arith.mulf %128, %125 : vector<8x32xf32>
    %130 = arith.mulf %129, %125 : vector<8x32xf32>
    %131 = arith.mulf %130, %125 : vector<8x32xf32>
    %132 = arith.addf %125, %131 : vector<8x32xf32>
    %cst_38 = arith.constant 0.797884583 : f32
    %133 = vector.broadcast %cst_38 : f32 to vector<8x32xf32>
    %134 = arith.mulf %133, %132 : vector<8x32xf32>
    %135 = math.tanh %134 : vector<8x32xf32>
    %cst_39 = arith.constant 1.000000e+00 : f32
    %136 = vector.broadcast %cst_39 : f32 to vector<8x32xf32>
    %137 = arith.addf %136, %135 : vector<8x32xf32>
    %138 = arith.mulf %127, %137 : vector<8x32xf32>
    %139 = arith.addf %138, %0 : vector<8x32xf32>
    %c0_40 = arith.constant 0 : index
    %c0_41 = arith.constant 0 : index
    %140 = vector.load %arg8[%c0_40, %c0_41] : memref<8x32xf32, #tpu.memory_space<vmem>>, vector<8x32xf32>
    tpu.vector_store %arg8[%c0_40, %c0_41], %139 {strides = array<i32>} : memref<8x32xf32, #tpu.memory_space<vmem>>, vector<8x32xf32>,
    return
  }
  func.func @transform_0(%arg0: i32) -> (i32, i32) {
    %c0_i32 = arith.constant 0 : i32
    %c0_i32_0 = arith.constant 0 : i32
    return %arg0, %c0_i32 : i32, i32
  }
  func.func @transform_1(%arg0: i32) -> (i32, i32) {
    %c0_i32 = arith.constant 0 : i32
    %c0_i32_0 = arith.constant 0 : i32
    %c0_i32_1 = arith.constant 0 : i32
    return %c0_i32, %c0_i32_0 : i32, i32
  }
  func.func @transform_2(%arg0: i32) -> (i32, i32) {
    %c0_i32 = arith.constant 0 : i32
    %c0_i32_0 = arith.constant 0 : i32
    %c0_i32_1 = arith.constant 0 : i32
    return %c0_i32, %c0_i32_0 : i32, i32
  }
  func.func @transform_3(%arg0: i32) -> (i32, i32) {
    %c0_i32 = arith.constant 0 : i32
    %c0_i32_0 = arith.constant 0 : i32
    %c0_i32_1 = arith.constant 0 : i32
    return %c0_i32, %c0_i32_0 : i32, i32
  }
  func.func @transform_4(%arg0: i32) -> (i32, i32) {
    %c0_i32 = arith.constant 0 : i32
    %c0_i32_0 = arith.constant 0 : i32
    %c0_i32_1 = arith.constant 0 : i32
    return %c0_i32, %c0_i32_0 : i32, i32
  }
  func.func @transform_5(%arg0: i32) -> (i32, i32) {
    %c0_i32 = arith.constant 0 : i32
    %c0_i32_0 = arith.constant 0 : i32
    %c0_i32_1 = arith.constant 0 : i32
    return %c0_i32, %c0_i32_0 : i32, i32
  }
  func.func @transform_6(%arg0: i32) -> (i32, i32) {
    %c0_i32 = arith.constant 0 : i32
    %c0_i32_0 = arith.constant 0 : i32
    %c0_i32_1 = arith.constant 0 : i32
    return %c0_i32, %c0_i32_0 : i32, i32
  }
  func.func @transform_7(%arg0: i32) -> (i32, i32) {
    %c0_i32 = arith.constant 0 : i32
    %c0_i32_0 = arith.constant 0 : i32
    return %arg0, %c0_i32 : i32, i32
  }
}

</mosaic_0001>

<bundles_post_ra>
// kernel: tpu_custom_call.1
= control target key start
LH: loop header
LB: loop body
LE: loop exit
PB: predicated region body
PF: predicated region fallthrough
CT: control target
= control target key end

     0   :  { %12 = vsyncpa [#allocation3], 0  ;;  %s985_s0 = inlined_call_operand.hbm [shape: f32[16,32], index: 0, kind: input, shape index: {}, may-alias: {0,7}]   ;;  %s986_s1 = inlined_call_operand.vmem [shape: f32[1,32], index: 1, kind: input, shape index: {}]   ;;  %s987_s2 = inlined_call_operand.vmem [shape: f32[1,32], index: 2, kind: input, shape index: {}]   ;;  %s988_s3 = inlined_call_operand.vmem [shape: f32[8,32], index: 3, kind: input, shape index: {}]   ;;  %s989_s4 = inlined_call_operand.vmem [shape: f32[1,32], index: 4, kind: input, shape index: {}]   ;;  %s990_s5 = inlined_call_operand.vmem [shape: bf16[32,32], index: 5, kind: input, shape index: {}]   ;;  %s991_s6 = inlined_call_operand.vmem [shape: f32[1,32], index: 6, kind: input, shape index: {}]   ;;  %s992_s7 = inlined_call_operand.hbm [shape: f32[16,32], index: 7, kind: output, shape index: {}, may-alias: {0,7}]  }
   0x1   :  { %14 = vsyncpa [#allocation3 + $0x1], 0 }
   0x2   :  { %15 = vsyncpa [#allocation4], 0 }
   0x3   :  { %17 = vsyncpa [#allocation4 + $0x1], 0  ;;  %s810_s24 = smov 0   ;;  %s812_s25 = smov 0  }
   0x4   :  { %s814_s26 = smov 0   ;;  %s816_s27 = smov 0  }
   0x5 LB: > { %s831_s28 = sadd.s32 4294967295, %s764_s27   ;;  %s587_s29 = sadd.s32 4294967294, %s764_s27   ;;  %s764_s27 = sphi %s816_s27, %s1009_s27   ;;  %s760_s26 = sphi %s814_s26, %s1008_s26   ;;  %s756_s25 = sphi %s812_s25, %s1007_s25   ;;  %s752_s24 = sphi %s810_s24, %s1006_s24  }
   0x6   : > { %s835_s30 = sadd.s32 1, %s764_s27   ;;  %s30_s8 = sadd.s32 1, %s760_s26 }
   0x7   : > { %s27_s9 = ssub.s32 %s764_s27, %s835_s30  ;;  %p37_p0 = scmp.ne.s32.totalorder %s760_s26, %s756_s25 }
   0x8   : > { %p28_p1 = scmp.eq.s32.totalorder %s27_s9, 0  ;;  %p38_p2 = scmp.eq.s32.totalorder %s764_s27, 0 }
   0x9   : > { %p43_p3 = scmp.ne.s32.totalorder %s756_s25, %s752_s24  ;;  %p44_p4 = scmp.eq.s32.totalorder %s831_s28, 0 }
   0xa   : > { %s847_s10 = scalar_select %p28_p1, %s760_s26, %s30_s8  }
   0xb   : > { %p849_p5 = por %p38_p2, %p37_p0  ;;  %p853_p6 = por %p44_p4, %p43_p3 }
   0xc   : > { %p193_p7 = scmp.eq.s32.totalorder %s831_s28, 1  ;;  %p199_p8 = scmp.eq.s32.totalorder %s587_s29, 1 }
   0xd   : > { %s996_s12 = scalar_select %p853_p6, 1, 0 }
   0xe   : > { %p628_p10 = scmp.lt.s32.totalorder %s764_s27, 2  ;;  %p860_p11 = por %p193_p7, %p37_p0 }
   0xf   : > { %p864_p12 = por %p199_p8, %p43_p3  ;;  %s237_s15 = sand.u32 1, %s760_s26  }
  0x10   : > { %s997_s13 = scalar_select %p860_p11, 1, 0 }
  0x11   : > { %s998_s14 = scalar_select %p864_p12, 1, 0 }
  0x12   : > { %s591_s16 = sshll.u32 %s764_s27, 7  ;;  %s590_s17 = sshll.u32 %s237_s15, 3 }
  0x13   : > { %s873_s20 = scalar_lea.hbm %s985_s0, %s591_s16  ;;  %s241_s21 = scalar_lea.vmem [#allocation2], %s590_s17 }
  0x14   : > { %s248_s22 = sshll.u32 %s241_s21, 4  ;;  %p877_p13 = pnand %p628_p10, %p849_p5  ;;  %s881_s22 = int_to_ptr.vmem [resolvable:$true] %s248_s22 }
  0x15   : > { %s238_s29 = scalar_lea.sflag [#allocation3], %s237_s15  ;;  %s672_s8 = scalar_lea.hbm %s873_s20, 128 }
  0x16   : > { %p673_p2 = scmp.ne.s32.totalorder %s873_s20, %s672_s8  ;;  %p674_p3 = pneg %p877_p13 }
  0x17   : > { %s677_s11 = scalar_lea.hbm %s985_s0, 256  ;;  %p678_p5 = scmp.lt.s32.totalorder %s873_s20, %s985_s0 }
  0x18   : > { %p675_p4 = pnand %p674_p3, %p673_p2  ;;  %p679_p8 = scmp.lt.s32.totalorder %s677_s11, %s672_s8 }
  0x1a   : > { %p676_p7 = pneg %p675_p4  ;;  %p680_p10 = por %p679_p8, %p678_p5 }
  0x1c   : > { %p681_p9 = pnand %p680_p10, %p676_p7 }
  0x1e   : > { %684 = shalt.err (!%p681_p9)
}
  0x1f   : > { %s685_s15 = scalar_lea.vmem %s881_s22, 128  ;;  %s766_s19 = smov [#allocation2]  }
  0x20   : > { %p686_p0 = scmp.ne.s32.totalorder %s881_s22, %s685_s15  ;;  %s690_s21 = sshll.u32 %s766_s19, 4  ;;  %s691_s21 = int_to_ptr.vmem [resolvable:$false] %s690_s21 }
  0x21   : > { %s692_s9 = scalar_lea.vmem %s691_s21, 256  ;;  %p693_p4 = scmp.lt.s32.totalorder %s881_s22, %s691_s21 }
  0x22   : > { %p688_p1 = pnand %p686_p0, %p674_p3  ;;  %p694_p12 = scmp.lt.s32.totalorder %s692_s9, %s685_s15 }
  0x24   : > { %p689_p2 = pneg %p688_p1  ;;  %p695_p11 = por %p694_p12, %p693_p4 }
  0x26   : > { %p696_p6 = pnand %p695_p11, %p689_p2 }
  0x28   : > { %699 = shalt.err (!%p696_p6)
}
  0x29   : > { %623 = dma.hbm_to_vmem [thread:$0]  (!%p877_p13), %s873_s20, 128, %s881_s22, %s238_s29  }
  0x2a   : > { %p1000_p9 = scmp.lt.s32.totalorder %s764_s27, 3  ;;  %p1001_p7 = scmp.ge.s32.totalorder %s764_s27, 1 }
  0x2c   : > { %p254_p0 = pnand %p1001_p7, %p1000_p9 }
  0x2d   : > { %s908_s8 = sand.u32 (!%p254_p0), 1, %s756_s25   ;;  %p1002_p6 = scmp.ne.s32.totalorder (!%p254_p0), %s996_s12, 0 }
  0x2e   : > { %257 = sbr.rel (%p254_p0) target bundleno = 648 (0x288), region = 48  ;;  %s593_s16 = sshll.u32 (!%p254_p0), %s908_s8, 3 }
  0x2f   : > { %s260_s11 = scalar_lea.sflag (!%p254_p0), [#allocation3], %s908_s8  ;;  %s263_s23 = scalar_lea.vmem (!%p254_p0), [#allocation2], %s593_s16 }
  0x33   : > { %743 = dma.done.wait (%p1002_p6), %s260_s11, 128  }
  0x34   : > { %745 = vsyncadd (%p1002_p6), %s260_s11, 4294967168  ;;  %vm296_vm0 = vcmask 261120   ;;  %v918_v0 = vld [vmem:[%s263_s23] sm:$0xff]  ;;  %v767_v8 = vmov 0.0   ;;  %vm768_vm1 = vmmov 0   ;;  %v327_v13 = vlaneseq  ;;  %s602_s12 = sshll.u32 %s831_s28, 7 }
  0x35   : > { %v297_v1 = vsel %vm296_vm0, %v918_v0, 0.0  ;;  %v664_v7 = vld [vmem:[%s990_s5 + $0x8] sm:$0xff]   ;;  %608 = vmatprep.subr.bf16.mxu0 %v767_v8  ;;  %612 = vmatprep.mubr.msk.bf16.mxu0 %vm768_vm1, %v767_v8  ;;  %v665_v9 = vld [vmem:[%s990_s5] sm:$0xff]   ;;  %s293_s29 = scalar_lea.vmem [#allocation5], %s593_s16  ;;  %s515_s19 = scalar_lea.hbm %s992_s7, %s602_s12 }
  0x36   : > { %298 = vadd.xlane.f32.xlu0 %v297_v1  ;;  %609 = vmatpush3.bf16.msra.mxu0 %v664_v7  ;;  %v328_v14 = vshrl.u32 %v327_v13, 7  ;;  %v329_v15 = vld [vmem:[%s988_s3] sm:$0xff]  ;;  %s517_s17 = sshll.u32 %s293_s29, 4  ;;  %s504_s21 = scalar_lea.sflag [#allocation4], %s908_s8  ;;  %s518_s17 = int_to_ptr.vmem [resolvable:$true] %s517_s17 }
  0x37   : > { %610 = vmatprep.subr.bf16.mxu0 %v767_v8  ;;  %v330_v16 = vld [vmem:[%s989_s4] sm:$0x1]  ;;  %s700_s9 = scalar_lea.vmem %s518_s17, 128  ;;  %p1003_p12 = scmp.ne.s32.totalorder %s997_s13, 0 }
  0x38   : > { %v595_v18 = vld [vmem:[%s986_s1] ss:$0 sm:$0xff]  ;;  %v331_v21 = vadd.f32 %v330_v16, %v329_v15  ;;  %v335_v22 = vsub.s32 0, %v328_v14  ;;  %v346_v23 = vsub.s32 1, %v328_v14  ;;  %v357_v25 = vsub.s32 2, %v328_v14  ;;  %p701_p11 = scmp.ne.s32.totalorder %s518_s17, %s700_s9  ;;  %s769_s28 = smov [#allocation5]  }
  0x39   : > { %v596_v20 = vld [vmem:[%s987_s2] ss:$0 sm:$0xff]  ;;  %v368_v27 = vsub.s32 3, %v328_v14  ;;  %vm340_vm2 = vcmp.ge.s32.totalorder %v328_v14, 1  ;;  %vm351_vm3 = vcmp.ge.s32.totalorder %v328_v14, 2  ;;  %v379_v33 = vsub.s32 4, %v328_v14 }
  0x3a   : > { %611 = vmatpush3.bf16.msra.mxu0 %v665_v9  ;;  %v336_v28 = vrot.slane %v331_v21, %v335_v22  ;;  %v347_v29 = vrot.slane %v329_v15, %v346_v23  ;;  %v358_v34 = vrot.slane %v329_v15, %v357_v25  ;;  %vm362_vm4 = vcmp.ge.s32.totalorder %v328_v14, 3  ;;  %p702_p13 = pnand %p701_p11, %p1003_p12  ;;  %s704_s11 = sshll.u32 %s769_s28, 4  ;;  %s705_s11 = int_to_ptr.vmem [resolvable:$false] %s704_s11 }
  0x3b   : > { %v369_v37 = vrot.slane %v329_v15, %v368_v27  ;;  %vm373_vm5 = vcmp.ge.s32.totalorder %v328_v14, 4  ;;  %v390_v41 = vsub.s32 5, %v328_v14  ;;  %v380_v43 = vrot.slane %v329_v15, %v379_v33  ;;  %s706_s16 = scalar_lea.vmem %s705_s11, 256  ;;  %p707_p3 = scmp.lt.s32.totalorder %s518_s17, %s705_s11 }
  0x3c   : > { %vm384_vm6 = vcmp.ge.s32.totalorder %v328_v14, 5  ;;  %v401_v47 = vsub.s32 6, %v328_v14  ;;  %vm395_vm7 = vcmp.ge.s32.totalorder %v328_v14, 6  ;;  %v412_v53 = vsub.s32 7, %v328_v14  ;;  %p703_p1 = pneg %p702_p13  ;;  %p708_p5 = scmp.lt.s32.totalorder %s706_s16, %s700_s9 }
  0x3d   : > { %v391_v52 = vrot.slane %v329_v15, %v390_v41  ;;  %vm406_vm8 = vcmp.ge.s32.totalorder %v328_v14, 7 }
  0x3e   : > { %v402_v58 = vrot.slane %v329_v15, %v401_v47  ;;  %v413_v62 = vrot.slane %v329_v15, %v412_v53  ;;  %v597_v15 = vld [vmem:[%s991_s6] ss:$0 sm:$0xff]  ;;  %p709_p8 = por %p708_p5, %p707_p3 }
  0x40   : > { %p710_p10 = pnand %p709_p8, %p703_p1 }
  0xbf   : > { %v299_v2 = vpop.xlane.xlu0 %298 }
  0xc0   : > { %v301_v3 = vmul.f32 0.03125, %v299_v2 }
  0xc2   : > { %v302_v4 = vsub.f32 %v918_v0, %v301_v3 }
  0xc4   : > { %v303_v5 = vmul.f32 %v302_v4, %v302_v4 }
  0xc6   : > { %v304_v6 = vsel %vm296_vm0, %v303_v5, 0.0 }
  0xc7   : > { %305 = vadd.xlane.f32.xlu0 %v304_v6 }
 0x150   : > { %v306_v10 = vpop.xlane.xlu0 %305 }
 0x151   : > { %v307_v11 = vmul.f32 0.03125, %v306_v10 }
 0x153   : > { %v308_v12 = vadd.f32 1e-05, %v307_v11 }
 0x155   : > { %666 = vrsqrt.f32 %v308_v12 }
 0x162   : > { %v667_v17 = vpop.eup %666 }
 0x163   : > { %v310_v19 = vmul.f32 %v667_v17, %v302_v4 }
 0x165   : > { %v318_v24 = vmul.f32 %v595_v18, %v310_v19 }
 0x167   : > { %v326_v26 = vadd.f32 %v596_v20, %v318_v24 }
 0x169   : > { %v339_v30 = vrot.slane %v326_v26, 7  ;;  %v350_v31 = vrot.slane %v326_v26, 6  ;;  %v361_v32 = vrot.slane %v326_v26, 5  ;;  %v372_v38 = vrot.slane %v326_v26, 4 }
 0x16a   : > { %v338_v39 = vmul.f32 %v336_v28, %v326_v26  ;;  %v383_v44 = vrot.slane %v326_v26, 3  ;;  %v394_v49 = vrot.slane %v326_v26, 2  ;;  %v405_v55 = vrot.slane %v326_v26, 1 }
 0x16b   : > { %v343_v35 = vsel %vm340_vm2, %v339_v30, 0.0  ;;  %v354_v36 = vsel %vm351_vm3, %v350_v31, 0.0  ;;  %v365_v42 = vsel %vm362_vm4, %v361_v32, 0.0  ;;  %v376_v48 = vsel %vm373_vm5, %v372_v38, 0.0 }
 0x16c   : > { %v348_v40 = vmul.f32 %v347_v29, %v343_v35  ;;  %v359_v46 = vmul.f32 %v358_v34, %v354_v36  ;;  %v370_v51 = vmul.f32 %v369_v37, %v365_v42  ;;  %v387_v54 = vsel %vm384_vm6, %v383_v44, 0.0 }
 0x16d   : > { %v381_v57 = vmul.f32 %v380_v43, %v376_v48  ;;  %v398_v59 = vsel %vm395_vm7, %v394_v49, 0.0  ;;  %v392_v61 = vmul.f32 %v391_v52, %v387_v54  ;;  %v409_v63 = vsel %vm406_vm8, %v405_v55, 0.0 }
 0x16e   : > { %v349_v45 = vadd.f32 %v348_v40, %v338_v39  ;;  %v403_v2 = vmul.f32 %v402_v58, %v398_v59  ;;  %v414_v4 = vmul.f32 %v413_v62, %v409_v63 }
 0x170   : > { %v360_v50 = vadd.f32 %v359_v46, %v349_v45 }
 0x172   : > { %v371_v56 = vadd.f32 %v370_v51, %v360_v50 }
 0x174   : > { %v382_v60 = vadd.f32 %v381_v57, %v371_v56 }
 0x176   : > { %v393_v1 = vadd.f32 %v392_v61, %v382_v60 }
 0x178   : > { %v404_v3 = vadd.f32 %v403_v2, %v393_v1 }
 0x17a   : > { %v415_v5 = vadd.f32 %v414_v4, %v404_v3 }
 0x17c   : > { %v417_v6 = vmul.f32 0.044715, %v415_v5  ;;  %v416_v12 = vmul.f32 0.5, %v415_v5 }
 0x17e   : > { %v418_v7 = vmul.f32 %v417_v6, %v415_v5 }
 0x180   : > { %v419_v8 = vmul.f32 %v418_v7, %v415_v5 }
 0x182   : > { %v420_v9 = vadd.f32 %v419_v8, %v415_v5 }
 0x184   : > { %v421_v10 = vmul.f32 0.7978846, %v420_v9 }
 0x186   : > { %668 = vtanh.f32 %v421_v10 }
 0x193   : > { %v669_v11 = vpop.eup %668 }
 0x194   : > { %v423_v13 = vadd.f32 1.0, %v669_v11 }
 0x196   : > { %v424_v14 = vmul.f32 %v423_v13, %v416_v12 }
 0x198   : > { %v425_v16 = vpack.c.bf16 %v424_v14, %v424_v14 }
 0x19a   : > { %613 = vmatmul.mubr.msk.bf16.vlgmr.msra.gmra.mxu0 %vm296_vm0, %v425_v16 }
 0x25a   : > { %v486_v17 = vpop.f32.mrf.mxu0 }
 0x25b   : > { %v487_v18 = vadd.f32 %v597_v15, %v486_v17 }
 0x25c   : > { %v614_v19 = vpop.f32.mrf.mxu0 }
 0x25d   : > { %v493_v20 = vmul.f32 0.044715, %v487_v18  ;;  %v492_v28 = vmul.f32 0.5, %v487_v18 }
 0x25e   : > { %v489_v21 = vpop.f32.mrf.mxu0 }
 0x25f   : > { %v494_v22 = vmul.f32 %v493_v20, %v487_v18 }
 0x260   : > { %v615_v23 = vpop.f32.mrf.mxu0 }
 0x261   : > { %v495_v24 = vmul.f32 %v494_v22, %v487_v18 }
 0x263   : > { %v496_v25 = vadd.f32 %v495_v24, %v487_v18 }
 0x265   : > { %v497_v26 = vmul.f32 0.7978846, %v496_v25 }
 0x267   : > { %670 = vtanh.f32 %v497_v26 }
 0x274   : > { %v671_v27 = vpop.eup %670 }
 0x275   : > { %v499_v29 = vadd.f32 1.0, %v671_v27 }
 0x277   : > { %v500_v30 = vmul.f32 %v499_v29, %v492_v28 }
 0x279   : > { %v501_v31 = vadd.f32 %v500_v30, %v918_v0 }
 0x27b   : > { %502 = vst.msk [vmem:[%s293_s29] sm:$0xff] %vm296_vm0, %v501_v31 }
 0x27c   : > { %713 = shalt.err (!%p710_p10)
}
 0x27d   : > { %s714_s23 = scalar_lea.hbm %s515_s19, 128  ;;  %s718_s22 = scalar_lea.hbm %s992_s7, 256 }
 0x27e   : > { %p715_p2 = scmp.ne.s32.totalorder %s515_s19, %s714_s23  ;;  %p719_p7 = scmp.lt.s32.totalorder %s515_s19, %s992_s7 }
 0x27f   : > { %p720_p0 = scmp.lt.s32.totalorder %s718_s22, %s714_s23 }
 0x280   : > { %p716_p4 = pnand %p715_p2, %p1003_p12 }
 0x281   : > { %p721_p6 = por %p720_p0, %p719_p7 }
 0x282   : > { %p717_p9 = pneg %p716_p4 }
 0x284   : > { %p722_p11 = pnand %p721_p6, %p717_p9 }
 0x286   : > { %725 = shalt.err (!%p722_p11)
}
 0x287   : > { %618 = dma.vmem_to_hbm [thread:$0]  (%p1003_p12), %s518_s17, 128, %s515_s19, %s504_s21  }
 0x288 PF: > { %s529_s18 = sand.u32 1, %s752_s24   ;;  %p1004_p13 = scmp.ne.s32.totalorder %s998_s14, 0 }
 0x289   : > { %p1005_p1 = scmp.ge.s32.totalorder %s764_s27, 2  ;;  %s530_s15 = scalar_lea.sflag [#allocation4], %s529_s18 }
 0x28b   : > { %p625_p3 = pnand %p1005_p1, %p1004_p13 }
 0x28d   : > { %p626_p5 = pneg %p625_p3 }
 0x28f   : > { %747 = dma.done.wait (%p626_p5), %s530_s15, 128  }
 0x290   : > { %749 = vsyncadd (%p626_p5), %s530_s15, 4294967168  ;;  %p20_p8 = scmp.ge.s32.totalorder %s835_s30, 4   ;;  %s1006_s24 = smov %s756_s25 }
 0x291   : > { %s1007_s25 = smov %s760_s26  ;;  %s1008_s26 = smov %s847_s10 }
 0x292   : > { %s1009_s27 = smov %s835_s30  ;;  %22 = sbr.rel (!%p20_p8) target bundleno = 5 (0x5), region = 93 }
 0x297   :  { %535 = vsyncpa [#allocation3], 1 }
 0x298   :  { %537 = vsyncpa [#allocation3 + $0x1], 1 }
 0x299   :  { %538 = vsyncpa [#allocation4], 1 }
 0x29a   :  { %540 = vsyncpa [#allocation4 + $0x1], 1 }

// kernel: tpu_custom_call.1
= control target key start
LH: loop header
LB: loop body
LE: loop exit
PB: predicated region body
PF: predicated region fallthrough
CT: control target
= control target key end

     0   :  { %12 = vsyncpa [#allocation3], 0  ;;  %s985_s0 = inlined_call_operand.hbm [shape: f32[16,32], index: 0, kind: input, shape index: {}, may-alias: {0,7}]   ;;  %s986_s1 = inlined_call_operand.vmem [shape: f32[1,32], index: 1, kind: input, shape index: {}]   ;;  %s987_s2 = inlined_call_operand.vmem [shape: f32[1,32], index: 2, kind: input, shape index: {}]   ;;  %s988_s3 = inlined_call_operand.vmem [shape: f32[8,32], index: 3, kind: input, shape index: {}]   ;;  %s989_s4 = inlined_call_operand.vmem [shape: f32[1,32], index: 4, kind: input, shape index: {}]   ;;  %s990_s5 = inlined_call_operand.vmem [shape: bf16[32,32], index: 5, kind: input, shape index: {}]   ;;  %s991_s6 = inlined_call_operand.vmem [shape: f32[1,32], index: 6, kind: input, shape index: {}]   ;;  %s992_s7 = inlined_call_operand.hbm [shape: f32[16,32], index: 7, kind: output, shape index: {}, may-alias: {0,7}]  }
   0x1   :  { %14 = vsyncpa [#allocation3 + $0x1], 0 }
   0x2   :  { %15 = vsyncpa [#allocation4], 0 }
   0x3   :  { %17 = vsyncpa [#allocation4 + $0x1], 0  ;;  %s810_s24 = smov 0   ;;  %s812_s25 = smov 0  }
   0x4   :  { %s814_s26 = smov 0   ;;  %s816_s27 = smov 0  }
   0x5 LB: > { %s831_s28 = sadd.s32 4294967295, %s764_s27   ;;  %s587_s29 = sadd.s32 4294967294, %s764_s27   ;;  %s764_s27 = sphi %s816_s27, %s1009_s27   ;;  %s760_s26 = sphi %s814_s26, %s1008_s26   ;;  %s756_s25 = sphi %s812_s25, %s1007_s25   ;;  %s752_s24 = sphi %s810_s24, %s1006_s24  }
   0x6   : > { %s835_s30 = sadd.s32 1, %s764_s27   ;;  %s30_s8 = sadd.s32 1, %s760_s26 }
   0x7   : > { %s27_s9 = ssub.s32 %s764_s27, %s835_s30  ;;  %p37_p0 = scmp.ne.s32.totalorder %s760_s26, %s756_s25 }
   0x8   : > { %p28_p1 = scmp.eq.s32.totalorder %s27_s9, 0  ;;  %p38_p2 = scmp.eq.s32.totalorder %s764_s27, 0 }
   0x9   : > { %p43_p3 = scmp.ne.s32.totalorder %s756_s25, %s752_s24  ;;  %p44_p4 = scmp.eq.s32.totalorder %s831_s28, 0 }
   0xa   : > { %s847_s10 = scalar_select %p28_p1, %s760_s26, %s30_s8  }
   0xb   : > { %p849_p5 = por %p38_p2, %p37_p0  ;;  %p853_p6 = por %p44_p4, %p43_p3 }
   0xc   : > { %p193_p7 = scmp.eq.s32.totalorder %s831_s28, 1  ;;  %p199_p8 = scmp.eq.s32.totalorder %s587_s29, 1 }
   0xd   : > { %s996_s12 = scalar_select %p853_p6, 1, 0 }
   0xe   : > { %p628_p10 = scmp.lt.s32.totalorder %s764_s27, 2  ;;  %p860_p11 = por %p193_p7, %p37_p0 }
   0xf   : > { %p864_p12 = por %p199_p8, %p43_p3  ;;  %s237_s15 = sand.u32 1, %s760_s26  }
  0x10   : > { %s997_s13 = scalar_select %p860_p11, 1, 0 }
  0x11   : > { %s998_s14 = scalar_select %p864_p12, 1, 0 }
  0x12   : > { %s591_s16 = sshll.u32 %s764_s27, 7  ;;  %s590_s17 = sshll.u32 %s237_s15, 3 }
  0x13   : > { %s873_s20 = scalar_lea.hbm %s985_s0, %s591_s16  ;;  %s241_s21 = scalar_lea.vmem [#allocation2], %s590_s17 }
  0x14   : > { %s248_s22 = sshll.u32 %s241_s21, 4  ;;  %p877_p13 = pnand %p628_p10, %p849_p5  ;;  %s881_s22 = int_to_ptr.vmem [resolvable:$true] %s248_s22 }
  0x15   : > { %s238_s29 = scalar_lea.sflag [#allocation3], %s237_s15  ;;  %s672_s8 = scalar_lea.hbm %s873_s20, 128 }
  0x16   : > { %p673_p2 = scmp.ne.s32.totalorder %s873_s20, %s672_s8  ;;  %p674_p3 = pneg %p877_p13 }
  0x17   : > { %s677_s11 = scalar_lea.hbm %s985_s0, 256  ;;  %p678_p5 = scmp.lt.s32.totalorder %s873_s20, %s985_s0 }
  0x18   : > { %p675_p4 = pnand %p674_p3, %p673_p2  ;;  %p679_p8 = scmp.lt.s32.totalorder %s677_s11, %s672_s8 }
  0x1a   : > { %p676_p7 = pneg %p675_p4  ;;  %p680_p10 = por %p679_p8, %p678_p5 }
  0x1c   : > { %p681_p9 = pnand %p680_p10, %p676_p7 }
  0x1e   : > { %684 = shalt.err (!%p681_p9)
}
  0x1f   : > { %s685_s15 = scalar_lea.vmem %s881_s22, 128  ;;  %s766_s19 = smov [#allocation2]  }
  0x20   : > { %p686_p0 = scmp.ne.s32.totalorder %s881_s22, %s685_s15  ;;  %s690_s21 = sshll.u32 %s766_s19, 4  ;;  %s691_s21 = int_to_ptr.vmem [resolvable:$false] %s690_s21 }
  0x21   : > { %s692_s9 = scalar_lea.vmem %s691_s21, 256  ;;  %p693_p4 = scmp.lt.s32.totalorder %s881_s22, %s691_s21 }
  0x22   : > { %p688_p1 = pnand %p686_p0, %p674_p3  ;;  %p694_p12 = scmp.lt.s32.totalorder %s692_s9, %s685_s15 }
  0x24   : > { %p689_p2 = pneg %p688_p1  ;;  %p695_p11 = por %p694_p12, %p693_p4 }
  0x26   : > { %p696_p6 = pnand %p695_p11, %p689_p2 }
  0x28   : > { %699 = shalt.err (!%p696_p6)
}
  0x29   : > { %623 = dma.hbm_to_vmem [thread:$0]  (!%p877_p13), %s873_s20, 128, %s881_s22, %s238_s29  }
  0x2a   : > { %p1000_p9 = scmp.lt.s32.totalorder %s764_s27, 3  ;;  %p1001_p7 = scmp.ge.s32.totalorder %s764_s27, 1 }
  0x2c   : > { %p254_p0 = pnand %p1001_p7, %p1000_p9 }
  0x2d   : > { %s908_s8 = sand.u32 (!%p254_p0), 1, %s756_s25   ;;  %p1002_p6 = scmp.ne.s32.totalorder (!%p254_p0), %s996_s12, 0 }
  0x2e   : > { %257 = sbr.rel (%p254_p0) target bundleno = 648 (0x288), region = 48  ;;  %s593_s16 = sshll.u32 (!%p254_p0), %s908_s8, 3 }
  0x2f   : > { %s260_s11 = scalar_lea.sflag (!%p254_p0), [#allocation3], %s908_s8  ;;  %s263_s23 = scalar_lea.vmem (!%p254_p0), [#allocation2], %s593_s16 }
  0x33   : > { %743 = dma.done.wait (%p1002_p6), %s260_s11, 128  }
  0x34   : > { %745 = vsyncadd (%p1002_p6), %s260_s11, 4294967168  ;;  %vm296_vm0 = vcmask 261120   ;;  %v918_v0 = vld [vmem:[%s263_s23] sm:$0xff]  ;;  %v767_v8 = vmov 0.0   ;;  %vm768_vm1 = vmmov 0   ;;  %v327_v13 = vlaneseq  ;;  %s602_s12 = sshll.u32 %s831_s28, 7 }
  0x35   : > { %v297_v1 = vsel %vm296_vm0, %v918_v0, 0.0  ;;  %v664_v7 = vld [vmem:[%s990_s5 + $0x8] sm:$0xff]   ;;  %608 = vmatprep.subr.bf16.mxu0 %v767_v8  ;;  %612 = vmatprep.mubr.msk.bf16.mxu0 %vm768_vm1, %v767_v8  ;;  %v665_v9 = vld [vmem:[%s990_s5] sm:$0xff]   ;;  %s293_s29 = scalar_lea.vmem [#allocation5], %s593_s16  ;;  %s515_s19 = scalar_lea.hbm %s992_s7, %s602_s12 }
  0x36   : > { %298 = vadd.xlane.f32.xlu0 %v297_v1  ;;  %609 = vmatpush3.bf16.msra.mxu0 %v664_v7  ;;  %v328_v14 = vshrl.u32 %v327_v13, 7  ;;  %v329_v15 = vld [vmem:[%s988_s3] sm:$0xff]  ;;  %s517_s17 = sshll.u32 %s293_s29, 4  ;;  %s504_s21 = scalar_lea.sflag [#allocation4], %s908_s8  ;;  %s518_s17 = int_to_ptr.vmem [resolvable:$true] %s517_s17 }
  0x37   : > { %610 = vmatprep.subr.bf16.mxu0 %v767_v8  ;;  %v330_v16 = vld [vmem:[%s989_s4] sm:$0x1]  ;;  %s700_s9 = scalar_lea.vmem %s518_s17, 128  ;;  %p1003_p12 = scmp.ne.s32.totalorder %s997_s13, 0 }
  0x38   : > { %v595_v18 = vld [vmem:[%s986_s1] ss:$0 sm:$0xff]  ;;  %v331_v21 = vadd.f32 %v330_v16, %v329_v15  ;;  %v335_v22 = vsub.s32 0, %v328_v14  ;;  %v346_v23 = vsub.s32 1, %v328_v14  ;;  %v357_v25 = vsub.s32 2, %v328_v14  ;;  %p701_p11 = scmp.ne.s32.totalorder %s518_s17, %s700_s9  ;;  %s769_s28 = smov [#allocation5]  }
  0x39   : > { %v596_v20 = vld [vmem:[%s987_s2] ss:$0 sm:$0xff]  ;;  %v368_v27 = vsub.s32 3, %v328_v14  ;;  %vm340_vm2 = vcmp.ge.s32.totalorder %v328_v14, 1  ;;  %vm351_vm3 = vcmp.ge.s32.totalorder %v328_v14, 2  ;;  %v379_v33 = vsub.s32 4, %v328_v14 }
  0x3a   : > { %611 = vmatpush3.bf16.msra.mxu0 %v665_v9  ;;  %v336_v28 = vrot.slane %v331_v21, %v335_v22  ;;  %v347_v29 = vrot.slane %v329_v15, %v346_v23  ;;  %v358_v34 = vrot.slane %v329_v15, %v357_v25  ;;  %vm362_vm4 = vcmp.ge.s32.totalorder %v328_v14, 3  ;;  %p702_p13 = pnand %p701_p11, %p1003_p12  ;;  %s704_s11 = sshll.u32 %s769_s28, 4  ;;  %s705_s11 = int_to_ptr.vmem [resolvable:$false] %s704_s11 }
  0x3b   : > { %v369_v37 = vrot.slane %v329_v15, %v368_v27  ;;  %vm373_vm5 = vcmp.ge.s32.totalorder %v328_v14, 4  ;;  %v390_v41 = vsub.s32 5, %v328_v14  ;;  %v380_v43 = vrot.slane %v329_v15, %v379_v33  ;;  %s706_s16 = scalar_lea.vmem %s705_s11, 256  ;;  %p707_p3 = scmp.lt.s32.totalorder %s518_s17, %s705_s11 }
  0x3c   : > { %vm384_vm6 = vcmp.ge.s32.totalorder %v328_v14, 5  ;;  %v401_v47 = vsub.s32 6, %v328_v14  ;;  %vm395_vm7 = vcmp.ge.s32.totalorder %v328_v14, 6  ;;  %v412_v53 = vsub.s32 7, %v328_v14  ;;  %p703_p1 = pneg %p702_p13  ;;  %p708_p5 = scmp.lt.s32.totalorder %s706_s16, %s700_s9 }
  0x3d   : > { %v391_v52 = vrot.slane %v329_v15, %v390_v41  ;;  %vm406_vm8 = vcmp.ge.s32.totalorder %v328_v14, 7 }
  0x3e   : > { %v402_v58 = vrot.slane %v329_v15, %v401_v47  ;;  %v413_v62 = vrot.slane %v329_v15, %v412_v53  ;;  %v597_v15 = vld [vmem:[%s991_s6] ss:$0 sm:$0xff]  ;;  %p709_p8 = por %p708_p5, %p707_p3 }
  0x40   : > { %p710_p10 = pnand %p709_p8, %p703_p1 }
  0xbf   : > { %v299_v2 = vpop.xlane.xlu0 %298 }
  0xc0   : > { %v301_v3 = vmul.f32 0.03125, %v299_v2 }
  0xc2   : > { %v302_v4 = vsub.f32 %v918_v0, %v301_v3 }
  0xc4   : > { %v303_v5 = vmul.f32 %v302_v4, %v302_v4 }
  0xc6   : > { %v304_v6 = vsel %vm296_vm0, %v303_v5, 0.0 }
  0xc7   : > { %305 = vadd.xlane.f32.xlu0 %v304_v6 }
 0x150   : > { %v306_v10 = vpop.xlane.xlu0 %305 }
 0x151   : > { %v307_v11 = vmul.f32 0.03125, %v306_v10 }
 0x153   : > { %v308_v12 = vadd.f32 1e-05, %v307_v11 }
 0x155   : > { %666 = vrsqrt.f32 %v308_v12 }
 0x162   : > { %v667_v17 = vpop.eup %666 }
 0x163   : > { %v310_v19 = vmul.f32 %v667_v17, %v302_v4 }
 0x165   : > { %v318_v24 = vmul.f32 %v595_v18, %v310_v19 }
 0x167   : > { %v326_v26 = vadd.f32 %v596_v20, %v318_v24 }
 0x169   : > { %v339_v30 = vrot.slane %v326_v26, 7  ;;  %v350_v31 = vrot.slane %v326_v26, 6  ;;  %v361_v32 = vrot.slane %v326_v26, 5  ;;  %v372_v38 = vrot.slane %v326_v26, 4 }
 0x16a   : > { %v338_v39 = vmul.f32 %v336_v28, %v326_v26  ;;  %v383_v44 = vrot.slane %v326_v26, 3  ;;  %v394_v49 = vrot.slane %v326_v26, 2  ;;  %v405_v55 = vrot.slane %v326_v26, 1 }
 0x16b   : > { %v343_v35 = vsel %vm340_vm2, %v339_v30, 0.0  ;;  %v354_v36 = vsel %vm351_vm3, %v350_v31, 0.0  ;;  %v365_v42 = vsel %vm362_vm4, %v361_v32, 0.0  ;;  %v376_v48 = vsel %vm373_vm5, %v372_v38, 0.0 }
 0x16c   : > { %v348_v40 = vmul.f32 %v347_v29, %v343_v35  ;;  %v359_v46 = vmul.f32 %v358_v34, %v354_v36  ;;  %v370_v51 = vmul.f32 %v369_v37, %v365_v42  ;;  %v387_v54 = vsel %vm384_vm6, %v383_v44, 0.0 }
 0x16d   : > { %v381_v57 = vmul.f32 %v380_v43, %v376_v48  ;;  %v398_v59 = vsel %vm395_vm7, %v394_v49, 0.0  ;;  %v392_v61 = vmul.f32 %v391_v52, %v387_v54  ;;  %v409_v63 = vsel %vm406_vm8, %v405_v55, 0.0 }
 0x16e   : > { %v349_v45 = vadd.f32 %v348_v40, %v338_v39  ;;  %v403_v2 = vmul.f32 %v402_v58, %v398_v59  ;;  %v414_v4 = vmul.f32 %v413_v62, %v409_v63 }
 0x170   : > { %v360_v50 = vadd.f32 %v359_v46, %v349_v45 }
 0x172   : > { %v371_v56 = vadd.f32 %v370_v51, %v360_v50 }
 0x174   : > { %v382_v60 = vadd.f32 %v381_v57, %v371_v56 }
 0x176   : > { %v393_v1 = vadd.f32 %v392_v61, %v382_v60 }
 0x178   : > { %v404_v3 = vadd.f32 %v403_v2, %v393_v1 }
 0x17a   : > { %v415_v5 = vadd.f32 %v414_v4, %v404_v3 }
 0x17c   : > { %v417_v6 = vmul.f32 0.044715, %v415_v5  ;;  %v416_v12 = vmul.f32 0.5, %v415_v5 }
 0x17e   : > { %v418_v7 = vmul.f32 %v417_v6, %v415_v5 }
 0x180   : > { %v419_v8 = vmul.f32 %v418_v7, %v415_v5 }
 0x182   : > { %v420_v9 = vadd.f32 %v419_v8, %v415_v5 }
 0x184   : > { %v421_v10 = vmul.f32 0.7978846, %v420_v9 }
 0x186   : > { %668 = vtanh.f32 %v421_v10 }
 0x193   : > { %v669_v11 = vpop.eup %668 }
 0x194   : > { %v423_v13 = vadd.f32 1.0, %v669_v11 }
 0x196   : > { %v424_v14 = vmul.f32 %v423_v13, %v416_v12 }
 0x198   : > { %v425_v16 = vpack.c.bf16 %v424_v14, %v424_v14 }
 0x19a   : > { %613 = vmatmul.mubr.msk.bf16.vlgmr.msra.gmra.mxu0 %vm296_vm0, %v425_v16 }
 0x25a   : > { %v486_v17 = vpop.f32.mrf.mxu0 }
 0x25b   : > { %v487_v18 = vadd.f32 %v597_v15, %v486_v17 }
 0x25c   : > { %v614_v19 = vpop.f32.mrf.mxu0 }
 0x25d   : > { %v493_v20 = vmul.f32 0.044715, %v487_v18  ;;  %v492_v28 = vmul.f32 0.5, %v487_v18 }
 0x25e   : > { %v489_v21 = vpop.f32.mrf.mxu0 }
 0x25f   : > { %v494_v22 = vmul.f32 %v493_v20, %v487_v18 }
 0x260   : > { %v615_v23 = vpop.f32.mrf.mxu0 }
 0x261   : > { %v495_v24 = vmul.f32 %v494_v22, %v487_v18 }
 0x263   : > { %v496_v25 = vadd.f32 %v495_v24, %v487_v18 }
 0x265   : > { %v497_v26 = vmul.f32 0.7978846, %v496_v25 }
 0x267   : > { %670 = vtanh.f32 %v497_v26 }
 0x274   : > { %v671_v27 = vpop.eup %670 }
 0x275   : > { %v499_v29 = vadd.f32 1.0, %v671_v27 }
 0x277   : > { %v500_v30 = vmul.f32 %v499_v29, %v492_v28 }
 0x279   : > { %v501_v31 = vadd.f32 %v500_v30, %v918_v0 }
 0x27b   : > { %502 = vst.msk [vmem:[%s293_s29] sm:$0xff] %vm296_vm0, %v501_v31 }
 0x27c   : > { %713 = shalt.err (!%p710_p10)
}
 0x27d   : > { %s714_s23 = scalar_lea.hbm %s515_s19, 128  ;;  %s718_s22 = scalar_lea.hbm %s992_s7, 256 }
 0x27e   : > { %p715_p2 = scmp.ne.s32.totalorder %s515_s19, %s714_s23  ;;  %p719_p7 = scmp.lt.s32.totalorder %s515_s19, %s992_s7 }
 0x27f   : > { %p720_p0 = scmp.lt.s32.totalorder %s718_s22, %s714_s23 }
 0x280   : > { %p716_p4 = pnand %p715_p2, %p1003_p12 }
 0x281   : > { %p721_p6 = por %p720_p0, %p719_p7 }
 0x282   : > { %p717_p9 = pneg %p716_p4 }
 0x284   : > { %p722_p11 = pnand %p721_p6, %p717_p9 }
 0x286   : > { %725 = shalt.err (!%p722_p11)
}
 0x287   : > { %618 = dma.vmem_to_hbm [thread:$0]  (%p1003_p12), %s518_s17, 128, %s515_s19, %s504_s21  }
 0x288 PF: > { %s529_s18 = sand.u32 1, %s752_s24   ;;  %p1004_p13 = scmp.ne.s32.totalorder %s998_s14, 0 }
 0x289   : > { %p1005_p1 = scmp.ge.s32.totalorder %s764_s27, 2  ;;  %s530_s15 = scalar_lea.sflag [#allocation4], %s529_s18 }
 0x28b   : > { %p625_p3 = pnand %p1005_p1, %p1004_p13 }
 0x28d   : > { %p626_p5 = pneg %p625_p3 }
 0x28f   : > { %747 = dma.done.wait (%p626_p5), %s530_s15, 128  }
 0x290   : > { %749 = vsyncadd (%p626_p5), %s530_s15, 4294967168  ;;  %p20_p8 = scmp.ge.s32.totalorder %s835_s30, 4   ;;  %s1006_s24 = smov %s756_s25 }
 0x291   : > { %s1007_s25 = smov %s760_s26  ;;  %s1008_s26 = smov %s847_s10 }
 0x292   : > { %s1009_s27 = smov %s835_s30  ;;  %22 = sbr.rel (!%p20_p8) target bundleno = 5 (0x5), region = 93 }
 0x297   :  { %535 = vsyncpa [#allocation3], 1 }
 0x298   :  { %537 = vsyncpa [#allocation3 + $0x1], 1 }
 0x299   :  { %538 = vsyncpa [#allocation4], 1 }
 0x29a   :  { %540 = vsyncpa [#allocation4 + $0x1], 1 }

</bundles_post_ra>
